<compile_context>
chip_gen: v7x
topology: tpu7x:2x2x1
jax: 0.10.0
libtpu: 0.0.40
codegen_flags: <defaults>
</compile_context>

<pallas_src>
import functools

import numpy as np
import jax
import jax.numpy as jnp
from jax.experimental import pallas as pl
from jax.experimental.pallas import tpu as pltpu


def _round_up(x, m):
    return (x + m - 1) // m * m


# --------------------------------------------------------------------------- #
# Fused Pallas kernel: the whole GraphSAGE forward in one invocation.
# --------------------------------------------------------------------------- #
def _graphsage_fused_kernel(*refs, num_layers, src_rows):
    """refs = (feat_slab, B_0..B_{L-1}, Wcat_0..Wcat_{L-1}, out).

    feat_slab : (padded_total_rows, D_in)   all hop features stacked on rows
    B_k       : (src_rows[k], rows_of_layer_k_slab)  block-diagonal neighbor
                averaging matrix for layer k (1/num_samples folded in)
    Wcat_k    : (2*dims[k], dims[k+1])      [W_self ; W_neigh] stacked on K
    out       : (num_src_nodes, dims[L])
    """
    L = num_layers
    feat_ref = refs[0]
    b_refs = refs[1:1 + L]
    w_refs = refs[1 + L:1 + 2 * L]
    o_ref = refs[1 + 2 * L]

    f = feat_ref[...]                                       # (rows, D) fp32 slab
    for k in range(L):                                      # unrolled at trace time
        s1 = src_rows[k]
        # Neighbor mean for every live hop at once: one MXU matmul.
        aggr = jnp.dot(b_refs[k][...], f, preferred_element_type=jnp.float32)
        # Merged self/neighbor GEMM: [src | aggr] @ [W_self ; W_neigh].
        x = jnp.concatenate([f[:s1, :], aggr], axis=-1)
        h = jnp.dot(x, w_refs[k][...], preferred_element_type=jnp.float32)
        if k != L - 1:                                      # last SageGCN: no ReLU
            h = jnp.maximum(h, 0.0)
        f = h                                               # next layer's slab
    o_ref[...] = f
    # TODO(synk): aggr_method='concat' and neighbor agg 'sum'/'max' SageGCN
    # variants are not implemented; defaults ('mean' neighbors, 'sum' combine).


# --------------------------------------------------------------------------- #
# Wrapper: build averaging matrices / merged weights, call the fused kernel.
# --------------------------------------------------------------------------- #
def _block_avg_matrix(hop_sizes, sample_nums, n_hops, n_cols):
    """Matrix M (sum(hop_sizes[:n_hops]), n_cols) such that M @ feat_slab gives,
    for every source node of hops 0..n_hops-1, the mean of its sampled
    neighbors (which live one hop further down the slab)."""
    n_rows = int(sum(hop_sizes[:n_hops]))
    mat = np.zeros((n_rows, n_cols), np.float32)
    row_off, col_off = 0, hop_sizes[0]
    for h in range(n_hops):
        n, s = hop_sizes[h], sample_nums[h]
        for i in range(n):
            mat[row_off + i, col_off + i * s: col_off + (i + 1) * s] = 1.0 / s
        row_off += n
        col_off += n * s
    return jnp.asarray(mat)


def graphsage_forward(params, node_features_list, sample_num_lists):
    """Mirrors GraphSage.forward: layer k processes hops 0..num_layers-k-1."""
    L = len(sample_num_lists)
    assert len(node_features_list) == L + 1
    hop_sizes = [int(f.shape[0]) for f in node_features_list]
    for h in range(L):
        assert hop_sizes[h + 1] == hop_sizes[h] * sample_num_lists[h]
    d_out = params[-1][0].shape[1]

    # Stack every hop's features into one row-slab; pad rows to a sublane multiple.
    total_rows = sum(hop_sizes)
    padded_rows = _round_up(total_rows, 8)
    feat_slab = jnp.concatenate(node_features_list, axis=0)
    if padded_rows != total_rows:
        feat_slab = jnp.pad(feat_slab, ((0, padded_rows - total_rows), (0, 0)))

    b_mats, w_cats, src_rows = [], [], []
    for k in range(L):
        n_hops = L - k
        n_cols = padded_rows if k == 0 else int(sum(hop_sizes[:n_hops + 1]))
        b_mats.append(_block_avg_matrix(hop_sizes, sample_num_lists,
                                        n_hops, n_cols))
        w_self, w_neigh = params[k]
        w_cats.append(jnp.concatenate([w_self, w_neigh], axis=0))
        src_rows.append(int(sum(hop_sizes[:n_hops])))

    kernel = functools.partial(_graphsage_fused_kernel,
                               num_layers=L, src_rows=tuple(src_rows))
    vmem = pl.BlockSpec(memory_space=pltpu.MemorySpace.VMEM)
    return pl.pallas_call(
        kernel,
        out_shape=jax.ShapeDtypeStruct((hop_sizes[0], d_out), jnp.float32),
        in_specs=[vmem] * (1 + 2 * L),
        out_specs=vmem,
    )(feat_slab, *b_mats, *w_cats)


# --------------------------------------------------------------------------- #
# Parameters + pure-JAX reference (for correctness verification).
# --------------------------------------------------------------------------- #
def init_graphsage_params(key, input_dim, hidden_dim):
    """One SageGCN per layer: (W_self, W_neigh), both (D_in, D_out)."""
    dims = [input_dim] + list(hidden_dim)
    params = []
    for i in range(len(hidden_dim)):
        key, k1, k2 = jax.random.split(key, 3)
        scale = 1.0 / jnp.sqrt(jnp.float32(dims[i]))
        w_self = jax.random.uniform(k1, (dims[i], dims[i + 1]),
                                    jnp.float32, -scale, scale)
        w_neigh = jax.random.uniform(k2, (dims[i], dims[i + 1]),
                                     jnp.float32, -scale, scale)
        params.append((w_self, w_neigh))
    return params


def _reference_forward(params, node_features_list, sample_num_lists):
    L = len(sample_num_lists)
    feats = list(node_features_list)
    for k in range(L):
        w_self, w_neigh = params[k]
        nxt = []
        for hop in range(L - k):
            src = feats[hop]
            n = src.shape[0]
            neigh = feats[hop + 1].reshape(n, sample_num_lists[hop], -1)
            h = src @ w_self + neigh.mean(axis=1) @ w_neigh
            if k != L - 1:
                h = jnp.maximum(h, 0.0)
            nxt.append(h)
        feats = nxt
    return feats[0]


if __name__ == "__main__":
    # Small config: 2 GraphSAGE layers.
    input_dim = 16
    hidden_dim = [32, 16]
    sample_num_lists = [5, 5]
    num_node = 4

    key = jax.random.PRNGKey(0)
    key, kp, k0, k1, k2 = jax.random.split(key, 5)
    params = init_graphsage_params(kp, input_dim, hidden_dim)

    # node_features_list: hop-0, hop-1, hop-2 sampled neighborhood features.
    node_features_list = [
        jax.random.normal(k0, (num_node, input_dim), jnp.float32),
        jax.random.normal(k1, (num_node * sample_num_lists[0], input_dim),
                          jnp.float32),
        jax.random.normal(k2, (num_node * sample_num_lists[0]
                               * sample_num_lists[1], input_dim), jnp.float32),
    ]

    out = graphsage_forward(params, node_features_list, sample_num_lists)
    out = jax.block_until_ready(out)
    assert out.shape == (num_node, hidden_dim[-1])

    ref = jax.block_until_ready(
        _reference_forward(params, node_features_list, sample_num_lists))
    assert jnp.allclose(out, ref, rtol=1e-4, atol=1e-5), "mismatch vs reference"

    print("KERNEL_OK")
</pallas_src>

<mosaic_0001>
module attributes {stable_mosaic.version = 11 : i64} {
  func.func @_graphsage_fused_kernel(%arg0: memref<128x16xf32, #tpu.memory_space<vmem>>, %arg1: memref<24x128xf32, #tpu.memory_space<vmem>>, %arg2: memref<4x24xf32, #tpu.memory_space<vmem>>, %arg3: memref<32x32xf32, #tpu.memory_space<vmem>>, %arg4: memref<64x16xf32, #tpu.memory_space<vmem>>, %arg5: memref<4x16xf32, #tpu.memory_space<vmem>>) attributes {dimension_semantics = [], scalar_prefetch = 0 : i64, scratch_operands = 0 : i64, tpu.core_type = #tpu.core_type<tc>} {
    %c0 = arith.constant 0 : index
    %c0_0 = arith.constant 0 : index
    %0 = vector.load %arg0[%c0, %c0_0] : memref<128x16xf32, #tpu.memory_space<vmem>>, vector<128x16xf32>
    %c0_1 = arith.constant 0 : index
    %c0_2 = arith.constant 0 : index
    %1 = vector.load %arg1[%c0_1, %c0_2] : memref<24x128xf32, #tpu.memory_space<vmem>>, vector<24x128xf32>
    %cst = arith.constant dense<0.000000e+00> : vector<24x16xf32>
    %2 = tpu.matmul %1, %0, %cst {dimension_numbers = #tpu.dot_dimension_numbers<[1], [0], [0], [1], [0, 0, 1, 1], [], []>} : vector<24x128xf32>, vector<128x16xf32>, vector<24x16xf32> -> vector<24x16xf32>
    %3 = vector.extract_strided_slice %0 {offsets = [0, 0], sizes = [24, 16], strides = [1, 1]} : vector<128x16xf32> to vector<24x16xf32>
    %4 = tpu.concatenate %3, %2 in 1 : vector<24x16xf32>, vector<24x16xf32> -> vector<24x32xf32>
    %c0_3 = arith.constant 0 : index
    %c0_4 = arith.constant 0 : index
    %5 = vector.load %arg3[%c0_3, %c0_4] : memref<32x32xf32, #tpu.memory_space<vmem>>, vector<32x32xf32>
    %cst_5 = arith.constant dense<0.000000e+00> : vector<24x32xf32>
    %6 = tpu.matmul %4, %5, %cst_5 {dimension_numbers = #tpu.dot_dimension_numbers<[1], [0], [0], [1], [0, 0, 1, 1], [], []>} : vector<24x32xf32>, vector<32x32xf32>, vector<24x32xf32> -> vector<24x32xf32>
    %cst_6 = arith.constant 0.000000e+00 : f32
    %7 = vector.broadcast %cst_6 : f32 to vector<24x32xf32>
    %8 = arith.maximumf %6, %7 : vector<24x32xf32>
    %c0_7 = arith.constant 0 : index
    %c0_8 = arith.constant 0 : index
    %9 = vector.load %arg2[%c0_7, %c0_8] : memref<4x24xf32, #tpu.memory_space<vmem>>, vector<4x24xf32>
    %cst_9 = arith.constant dense<0.000000e+00> : vector<4x32xf32>
    %10 = tpu.matmul %9, %8, %cst_9 {dimension_numbers = #tpu.dot_dimension_numbers<[1], [0], [0], [1], [0, 0, 1, 1], [], []>} : vector<4x24xf32>, vector<24x32xf32>, vector<4x32xf32> -> vector<4x32xf32>
    %11 = vector.extract_strided_slice %8 {offsets = [0, 0], sizes = [4, 32], strides = [1, 1]} : vector<24x32xf32> to vector<4x32xf32>
    %12 = tpu.concatenate %11, %10 in 1 : vector<4x32xf32>, vector<4x32xf32> -> vector<4x64xf32>
    %c0_10 = arith.constant 0 : index
    %c0_11 = arith.constant 0 : index
    %13 = vector.load %arg4[%c0_10, %c0_11] : memref<64x16xf32, #tpu.memory_space<vmem>>, vector<64x16xf32>
    %cst_12 = arith.constant dense<0.000000e+00> : vector<4x16xf32>
    %14 = tpu.matmul %12, %13, %cst_12 {dimension_numbers = #tpu.dot_dimension_numbers<[1], [0], [0], [1], [0, 0, 1, 1], [], []>} : vector<4x64xf32>, vector<64x16xf32>, vector<4x16xf32> -> vector<4x16xf32>
    %c0_13 = arith.constant 0 : index
    %c0_14 = arith.constant 0 : index
    %15 = vector.load %arg5[%c0_13, %c0_14] : memref<4x16xf32, #tpu.memory_space<vmem>>, vector<4x16xf32>
    tpu.vector_store %arg5[%c0_13, %c0_14], %14 {strides = array<i32>} : memref<4x16xf32, #tpu.memory_space<vmem>>, vector<4x16xf32>,
    return
  }
}

</mosaic_0001>

<bundles_post_ra>
// kernel: tpu_custom_call.1
= control target key start
LH: loop header
LB: loop body
LE: loop exit
PB: predicated region body
PF: predicated region fallthrough
CT: control target
= control target key end

     0   :  { %v616_v3 = vmov 0.0|0.0   ;;  %vm617_vm0 = vmmov 0   ;;  %v618_v6 = vmov 0.0   ;;  %s808_s0 = inlined_call_operand.vmem [shape: f32[128,16], index: 0, kind: input, shape index: {}]   ;;  %s809_s1 = inlined_call_operand.vmem [shape: f32[24,128], index: 1, kind: input, shape index: {}]   ;;  %s810_s2 = inlined_call_operand.vmem [shape: f32[4,24], index: 2, kind: input, shape index: {}]   ;;  %s811_s3 = inlined_call_operand.vmem [shape: f32[32,32], index: 3, kind: input, shape index: {}]   ;;  %s812_s4 = inlined_call_operand.vmem [shape: f32[64,16], index: 4, kind: input, shape index: {}]   ;;  %s813_s5 = inlined_call_operand.hbm [shape: f32[4,16], index: 5, kind: output, shape index: {}]  }
   0x1   :  { %v655_v0 = vld [vmem:[%s808_s0] sm:$0xff]  ;;  %v660_v1 = vld [vmem:[%s808_s0 + $0x8] sm:$0xff]  ;;  %v665_v2 = vld [vmem:[%s808_s0 + $0x10] sm:$0xff]  ;;  %541 = vmatprep.subr.bf16.mxu0 %v616_v3  ;;  %487 = vmatprep.mubr.msk.f32.mxu0 %vm617_vm0, %v618_v6 }
   0x2   :  { %v542_v4 = vpack.c.bf16 %v660_v1, %v655_v0  ;;  %v24_v5 = vld [vmem:[%s808_s0 + $0x18] sm:$0xff]  ;;  %565 = vmatprep.subr.bf16.mxu1 %v616_v3  ;;  %504 = vmatprep.mubr.msk.f32.mxu1 %vm617_vm0, %v618_v6  ;;  %v25_v8 = vld [vmem:[%s808_s0 + $0x20] sm:$0xff]  ;;  %v26_v9 = vld [vmem:[%s808_s0 + $0x28] sm:$0xff] }
   0x3   :  { %v545_v7 = vpack.c.bf16 %v24_v5, %v665_v2 }
   0x4   :  { %543 = vmatpush3.bf16.msra.mxu0 %v542_v4 }
   0x5   :  { %544 = vmatprep.subr.bf16.mxu0 %v616_v3 }
   0x6   :  { %10 = vsyncpa [#allocation3], 0  ;;  %v548_v10 = vpack.c.bf16 %v26_v9, %v25_v8  ;;  %v27_v11 = vld [vmem:[%s808_s0 + $0x30] sm:$0xff]  ;;  %v28_v12 = vld [vmem:[%s808_s0 + $0x38] sm:$0xff]  ;;  %vm132_vm1 = vcmask 130048   ;;  %vm140_vm2 = vcmask 261120  }
   0x7   :  { %v551_v13 = vpack.c.bf16 %v28_v12, %v27_v11  ;;  %v29_v14 = vld [vmem:[%s808_s0 + $0x40] sm:$0xff]  ;;  %v30_v15 = vld [vmem:[%s808_s0 + $0x48] sm:$0xff]  ;;  %v31_v17 = vld [vmem:[%s808_s0 + $0x50] sm:$0xff]  ;;  %vm234_vm3 = vcmask 195584   ;;  %vm321_vm4 = vcmask 523264   ;;  %s621_s29 = smov [#allocation2]  }
   0x8   :  { %546 = vmatpush3.bf16.msra.mxu0 %v545_v7  ;;  %v554_v16 = vpack.c.bf16 %v30_v15, %v29_v14  ;;  %v32_v18 = vld [vmem:[%s808_s0 + $0x58] sm:$0xff]  ;;  %v33_v20 = vld [vmem:[%s808_s0 + $0x60] sm:$0xff]  ;;  %v34_v21 = vld [vmem:[%s808_s0 + $0x68] sm:$0xff]  ;;  %s403_s30 = sshll.u32 %s621_s29, 4  ;;  %vm395_vm5 = vcmask 125952   ;;  %s404_s30 = int_to_ptr.vmem [resolvable:$true] %s403_s30 }
   0x9   :  { %547 = vmatprep.subr.bf16.mxu0 %v616_v3  ;;  %v557_v19 = vpack.c.bf16 %v32_v18, %v31_v17  ;;  %v560_v22 = vpack.c.bf16 %v34_v21, %v33_v20  ;;  %v35_v23 = vld [vmem:[%s808_s0 + $0x70] sm:$0xff]  ;;  %v36_v24 = vld [vmem:[%s808_s0 + $0x78] sm:$0xff]  ;;  %v37_v26 = vld [vmem:[%s809_s1] sm:$0xff]  ;;  %s620_s0 = smov 32   ;;  %p597_p1 = scmp.lt.s32.totalorder %s404_s30, %s404_s30 }
   0xa   :  { %v563_v25 = vpack.c.bf16 %v36_v24, %v35_v23  ;;  %v38_v27 = vld [vmem:[%s809_s1 + $0x8] sm:$0xff]  ;;  %v39_v28 = vld [vmem:[%s809_s1 + $0x10] sm:$0xff]  ;;  %v136_v29 = vld [vmem:[%s811_s3] sm:$0xff]  ;;  %s619_s1 = smov 16  }
   0xb   :  { %v137_v30 = vld [vmem:[%s811_s3 + $0x8] sm:$0xff]  ;;  %v138_v31 = vld [vmem:[%s811_s3 + $0x10] sm:$0xff]  ;;  %v139_v33 = vld [vmem:[%s811_s3 + $0x18] sm:$0xff] }
   0xc   :  { %549 = vmatpush3.bf16.msra.mxu0 %v548_v10  ;;  %v566_v32 = vpack.c.bf16 %v137_v30, %v136_v29  ;;  %v569_v34 = vpack.c.bf16 %v139_v33, %v138_v31  ;;  %v233_v57 = vld [vmem:[%s810_s2] sm:$0xf]  ;;  %v314_v59 = vld [vmem:[%s812_s4 + $0x8] sm:$0xff]  ;;  %v315_v60 = vld [vmem:[%s812_s4 + $0x10] sm:$0xff] }
   0xd   :  { %550 = vmatprep.subr.bf16.mxu0 %v616_v3  ;;  %v313_v58 = vld [vmem:[%s812_s4] sm:$0xff]  ;;  %v316_v62 = vld [vmem:[%s812_s4 + $0x18] sm:$0xff]  ;;  %v319_v4 = vld [vmem:[%s812_s4 + $0x30] sm:$0xff] }
   0xe   :  { %567 = vmatpush3.bf16.msra.mxu1 %v566_v32  ;;  %v575_v61 = vpack.c.bf16 %v314_v59, %v313_v58  ;;  %v578_v63 = vpack.c.bf16 %v316_v62, %v315_v60  ;;  %v320_v5 = vld [vmem:[%s812_s4 + $0x38] sm:$0xff] }
   0xf   :  { %568 = vmatprep.subr.bf16.mxu1 %v616_v3 }
  0x10   :  { %552 = vmatpush3.bf16.msra.mxu0 %v551_v13 }
  0x11   :  { %553 = vmatprep.subr.bf16.mxu0 %v616_v3 }
  0x12   :  { %570 = vmatpush3.bf16.msra.mxu1 %v569_v34 }
  0x13   :  { %571 = vmatprep.subr.bf16.mxu1 %v616_v3 }
  0x14   :  { %555 = vmatpush3.bf16.msra.mxu0 %v554_v16 }
  0x15   :  { %556 = vmatprep.subr.bf16.mxu0 %v616_v3 }
  0x18   :  { %558 = vmatpush3.bf16.msra.mxu0 %v557_v19 }
  0x19   :  { %559 = vmatprep.subr.bf16.mxu0 %v616_v3 }
  0x1c   :  { %561 = vmatpush3.bf16.msra.mxu0 %v560_v22 }
  0x1d   :  { %562 = vmatprep.subr.bf16.mxu0 %v616_v3 }
  0x20   :  { %564 = vmatpush3.bf16.msra.mxu0 %v563_v25 }
  0x23   :  { %488 = vmatmul.mubr.f32.vlgmr.msra.gmra.mrb[0].mxu0 %v37_v26 }
  0x24   :  { %490 = vmatprep.mubr.msk.f32.mxu0 %vm617_vm0, %v618_v6 }
  0x27   :  { %491 = vmatmul.mubr.f32.gmra.mrb[2].mxu0 %v38_v27 }
  0x28   :  { %493 = vmatprep.mubr.msk.f32.mxu0 %vm617_vm0, %v618_v6 }
  0x2b   :  { %494 = vmatmul.mubr.f32.gmra.mrb[4].mxu0 %v39_v28 }
  0xf6   :  { %v106_v35 = vpop.f32.mrb[0].mxu0 }
  0xf7   :  { %123 = vrot.lane.b32.xlu0 %v106_v35, %s619_s1  ;;  %v489_v36 = vpop.f32.mrb[1].mxu0 }
  0xfa   :  { %v111_v37 = vpop.f32.mrb[2].mxu0 }
  0xfb   :  { %125 = vrot.lane.b32.xlu0 %v111_v37, %s619_s1  ;;  %v492_v38 = vpop.f32.mrb[3].mxu0 }
  0xfe   :  { %v116_v39 = vpop.f32.mrb[4].mxu0 }
  0xff   :  { %127 = vrot.lane.b32.xlu1 %v116_v39, %s619_s1  ;;  %v495_v40 = vpop.f32.mrb[5].mxu0 }
 0x169   :  { %v124_v41 = vpop.permute.xlu0 %123 }
 0x16a   :  { %v133_v42 = vsel %vm132_vm1, %v655_v0, %v124_v41  ;;  %v317_v0 = vld [vmem:[%s812_s4 + $0x20] sm:$0xff] }
 0x16b   :  { %505 = vmatmul.mubr.msk.f32.vlgmr.msra.gmra.mrb[0].mxu1 %vm140_vm2, %v133_v42 }
 0x16c   :  { %507 = vmatprep.mubr.msk.f32.mxu1 %vm617_vm0, %v618_v6 }
 0x16d   :  { %v126_v43 = vpop.permute.xlu0 %125 }
 0x16e   :  { %v134_v44 = vsel %vm132_vm1, %v660_v1, %v126_v43  ;;  %v318_v1 = vld [vmem:[%s812_s4 + $0x28] sm:$0xff]  ;;  %s592_s4 = scalar_lea.vmem %s404_s30, 64 }
 0x16f   :  { %508 = vmatmul.mubr.msk.f32.gmra.mrb[2].mxu1 %vm140_vm2, %v134_v44  ;;  %p593_p0 = scmp.ne.s32.totalorder %s404_s30, %s592_s4  ;;  %p598_p2 = scmp.lt.s32.totalorder %s592_s4, %s592_s4 }
 0x170   :  { %510 = vmatprep.mubr.msk.f32.mxu1 %vm617_vm0, %v618_v6 }
 0x171   :  { %v128_v45 = vpop.permute.xlu1 %127  ;;  %p599_p3 = por %p598_p2, %p597_p1 }
 0x172   :  { %v135_v46 = vsel %vm132_vm1, %v665_v2, %v128_v45  ;;  %v581_v2 = vpack.c.bf16 %v318_v1, %v317_v0 }
 0x173   :  { %511 = vmatmul.mubr.msk.f32.gmra.mrb[4].mxu1 %vm140_vm2, %v135_v46  ;;  %p600_p4 = pnand %p599_p3, %p593_p0 }
 0x174   :  { %519 = vmatprep.mubr.msk.f32.mxu1 %vm617_vm0, %v618_v6 }
 0x23e   :  { %v216_v47 = vpop.f32.mrb[0].mxu1 }
 0x23f   :  { %v506_v48 = vpop.f32.mrb[1].mxu1  ;;  %v230_v50 = vmax.f32 %v216_v47, 0.0 }
 0x242   :  { %v221_v49 = vpop.f32.mrb[2].mxu1 }
 0x243   :  { %v231_v51 = vmax.f32 %v221_v49, 0.0  ;;  %v509_v52 = vpop.f32.mrb[3].mxu1 }
 0x245   :  { %v572_v53 = vpack.c.bf16 %v231_v51, %v230_v50 }
 0x246   :  { %v226_v54 = vpop.f32.mrb[4].mxu1 }
 0x247   :  { %573 = vmatpush3.bf16.msra.mxu1 %v572_v53  ;;  %v232_v55 = vmax.f32 %v226_v54, 0.0  ;;  %v512_v56 = vpop.f32.mrb[5].mxu1 }
 0x248   :  { %517 = vmatprep.subr.mxu1 %v618_v6 }
 0x24b   :  { %518 = vmatpush3.msra.mxu1 %v232_v55 }
 0x24c   :  { %520 = vmatmul.mubr.msk.f32.vlgmr.msra.gmra.mrb[6].mxu1 %vm234_vm3, %v233_v57  ;;  %574 = vmatprep.subr.bf16.mxu1 %v616_v3 }
 0x24d   :  { %538 = vmatprep.mubr.msk.f32.mxu1 %vm617_vm0, %v618_v6  ;;  %576 = vmatpush3.bf16.msra.mxu1 %v575_v61  ;;  %v584_v6 = vpack.c.bf16 %v320_v5, %v319_v4 }
 0x24e   :  { %577 = vmatprep.subr.bf16.mxu1 %v616_v3 }
 0x251   :  { %579 = vmatpush3.bf16.msra.mxu1 %v578_v63 }
 0x252   :  { %580 = vmatprep.subr.bf16.mxu1 %v616_v3 }
 0x255   :  { %582 = vmatpush3.bf16.msra.mxu1 %v581_v2 }
 0x256   :  { %583 = vmatprep.subr.bf16.mxu1 %v616_v3 }
 0x259   :  { %585 = vmatpush3.bf16.msra.mxu1 %v584_v6 }
 0x31f   :  { %v304_v7 = vpop.f32.mrb[6].mxu1 }
 0x320   :  { %309 = vrot.lane.b32.xlu1 %v304_v7, %s620_s0  ;;  %v521_v8 = vpop.f32.mrb[7].mxu1 }
 0x392   :  { %v310_v9 = vpop.permute.xlu1 %309 }
 0x393   :  { %v312_v10 = vsel %vm140_vm2, %v230_v50, %v310_v9 }
 0x394   :  { %539 = vmatmul.mubr.msk.f32.vlgmr.msra.gmra.mrb[8].mxu1 %vm321_vm4, %v312_v10 }
 0x467   :  { %v391_v11 = vpop.f32.mrb[8].mxu1 }
 0x468   :  { %396 = vst.msk [vmem:[#allocation2] sm:$0xf] %vm395_vm5, %v391_v11  ;;  %v540_v12 = vpop.f32.mrb[9].mxu1 }
 0x469   :  { %603 = shalt.err (!%p600_p4)
}
 0x46a   :  { %s604_s8 = scalar_lea.hbm %s813_s5, 64 }
 0x46b   :  { %p605_p5 = scmp.ne.s32.totalorder %s813_s5, %s604_s8  ;;  %p608_p6 = scmp.lt.u32.totalorder %s604_s8, %s813_s5 }
 0x46d   :  { %p610_p7 = pnand %p608_p6, %p605_p5 }
 0x46f   :  { %613 = shalt.err (!%p610_p7)
}
 0x470   :  { %406 = dma.vmem_to_hbm [thread:$0]  %s404_s30, 64, %s813_s5, [#allocation3]  }
 0x471   :  { %614 = dma.done.wait [#allocation3], 64  }
 0x472   :  { %615 = vsyncadd [#allocation3], 4294967232 }
 0x473   :  { %410 = vsyncpa [#allocation3], 1 }

</bundles_post_ra>
